<compile_context>
chip_gen: v7x
topology: tpu7x:2x2x1
jax: 0.10.0
libtpu: 0.0.40
codegen_flags: <defaults>
</compile_context>

<pallas_src>
import functools

import jax
import jax.numpy as jnp
from jax.experimental import pallas as pl
from jax.experimental.pallas import tpu as pltpu


def _round_up(v: int, m: int) -> int:
    return (v + m - 1) // m * m


def _vae_forward_kernel(x_ref, eps_ref,
                        we1_ref, be1_ref,
                        wh_ref, bh_ref,
                        wd1_ref, bd1_ref,
                        wd2_ref, bd2_ref,
                        out_ref, mu_ref, lv_ref,
                        *, activate: bool, lat_pad: int):
    """Fused VAE forward for one batch tile.

    x_ref   : (TILE_N, D_pad)        bf16 input tile
    eps_ref : (TILE_N, LAT_PAD)      f32 reparameterization noise
    we1/be1 : (D_pad, H_pad) bf16 / (1, H_pad) f32      encoder layer 1
    wh/bh   : (H_pad, 2*LAT_PAD) f32 / (1, 2*LAT_PAD)   folded enc-layer-2 + [mu|logvar] heads
    wd1/bd1 : (LAT_PAD, H_pad) f32 / (1, H_pad)         decoder layer 1
    wd2/bd2 : (H_pad, D_pad) bf16 / (1, D_pad) f32      decoder layer 2
    """
    # ---- encoder layer 1 (bf16 MXU, f32 accumulation) ----
    h_enc = jnp.dot(x_ref[...], we1_ref[...],
                    preferred_element_type=jnp.float32) + be1_ref[...]
    h_enc = jnp.maximum(h_enc, 0.0)

    # ---- fused encoder layer 2 + gaussian heads: one matmul -> [mu | logvar] ----
    heads = jnp.dot(h_enc, wh_ref[...],
                    preferred_element_type=jnp.float32) + bh_ref[...]
    mu = heads[:, :lat_pad]
    logvar = heads[:, lat_pad:]

    # ---- reparameterization ----
    z = mu + eps_ref[...] * jnp.exp(0.5 * logvar)

    # ---- decoder ----
    h_dec = jnp.dot(z, wd1_ref[...],
                    preferred_element_type=jnp.float32) + bd1_ref[...]
    h_dec = jnp.maximum(h_dec, 0.0)
    out = jnp.dot(h_dec.astype(jnp.bfloat16), wd2_ref[...],
                  preferred_element_type=jnp.float32) + bd2_ref[...]

    if activate:  # compile-time branch (VAEBase.forward default: activate=False)
        out = jax.nn.sigmoid(out)

    out_ref[...] = out
    mu_ref[...] = mu
    lv_ref[...] = logvar


def prepare_params(params, *, d_pad: int, h_pad: int, lat_pad: int):
    """Pad / fold / cast PyTorch-layout params into kernel-ready weights."""
    (we1, be1, we2, be2, wmu, bmu, wlv, blv, wd1, bd1, wd2, bd2) = params
    d, hidden = we1.shape
    latent = wmu.shape[1]
    f32 = jnp.float32

    # Encoder layer 1 (large): pad + bf16.
    we1_p = jnp.zeros((d_pad, h_pad), f32).at[:d, :hidden].set(we1).astype(jnp.bfloat16)
    be1_p = jnp.zeros((1, h_pad), f32).at[:, :hidden].set(be1)

    # Fold encoder layer 2 into the gaussian heads (no nonlinearity between them):
    #   mu     = (h @ We2 + be2) @ Wmu + bmu = h @ (We2 @ Wmu) + (be2 @ Wmu + bmu)
    #   logvar analogous. Emitted as a single lane-dense [mu | logvar] block.
    wmu_f, bmu_f = we2 @ wmu, be2 @ wmu + bmu
    wlv_f, blv_f = we2 @ wlv, be2 @ wlv + blv
    wh = jnp.zeros((h_pad, 2 * lat_pad), f32)
    wh = wh.at[:hidden, :latent].set(wmu_f)
    wh = wh.at[:hidden, lat_pad:lat_pad + latent].set(wlv_f)
    bh = jnp.zeros((1, 2 * lat_pad), f32)
    bh = bh.at[:, :latent].set(bmu_f)
    bh = bh.at[:, lat_pad:lat_pad + latent].set(blv_f)

    # Decoder layer 1 (small): f32, padded.
    wd1_p = jnp.zeros((lat_pad, h_pad), f32).at[:latent, :hidden].set(wd1)
    bd1_p = jnp.zeros((1, h_pad), f32).at[:, :hidden].set(bd1)

    # Decoder layer 2 (large): pad + bf16.
    wd2_p = jnp.zeros((h_pad, d_pad), f32).at[:hidden, :d].set(wd2).astype(jnp.bfloat16)
    bd2_p = jnp.zeros((1, d_pad), f32).at[:, :d].set(bd2)

    return (we1_p, be1_p, wh, bh, wd1_p, bd1_p, wd2_p, bd2_p)


def vae_forward(x_nchw, eps, params, *, activate: bool = False, tile_n: int = 128):
    """Runs the fused VAE forward. Returns [X_hat (NCHW), mu, logvar]."""
    n, c, h, w = x_nchw.shape
    d = c * h * w
    hidden = params[0].shape[1]
    latent = params[4].shape[1]

    # Lane-dense padding for every feature dim, sublane-aligned batch tiling.
    d_pad = _round_up(d, 128)
    h_pad = _round_up(hidden, 128)
    lat_pad = _round_up(latent, 128)
    tile_n = max(8, min(_round_up(tile_n, 8), _round_up(n, 8)))
    n_pad = _round_up(n, tile_n)

    x_flat = x_nchw.reshape(n, d).astype(jnp.float32)
    x_p = jnp.zeros((n_pad, d_pad), jnp.float32).at[:n, :d].set(x_flat).astype(jnp.bfloat16)
    eps_p = jnp.zeros((n_pad, lat_pad), jnp.float32).at[:n, :latent].set(
        eps.astype(jnp.float32))

    wparams = prepare_params(params, d_pad=d_pad, h_pad=h_pad, lat_pad=lat_pad)

    grid = (n_pad // tile_n,)

    def batch_spec(cols):
        return pl.BlockSpec((tile_n, cols), lambda i: (i, 0))

    def const_spec(shape):
        # Constant index_map: DMA'd once, stays resident in VMEM across grid steps.
        return pl.BlockSpec(shape, lambda i: (0, 0))

    in_specs = ([batch_spec(d_pad), batch_spec(lat_pad)]
                + [const_spec(wp.shape) for wp in wparams])
    out_specs = (batch_spec(d_pad), batch_spec(lat_pad), batch_spec(lat_pad))

    # Explicit VMEM budget: resident weights (x2 buffers) + double-buffered
    # activation tiles + headroom for intermediates. Capped at v7x's 64 MiB.
    weight_bytes = sum(wp.size * wp.dtype.itemsize for wp in wparams)
    tile_bytes = (tile_n * d_pad * 2          # x tile (bf16)
                  + tile_n * lat_pad * 4      # eps tile
                  + tile_n * d_pad * 4        # out tile
                  + 2 * tile_n * lat_pad * 4)  # mu, logvar tiles
    vmem_limit = min(2 * weight_bytes + 2 * tile_bytes + (8 << 20), 64 << 20)

    out_p, mu_p, lv_p = pl.pallas_call(
        functools.partial(_vae_forward_kernel, activate=activate, lat_pad=lat_pad),
        out_shape=(
            jax.ShapeDtypeStruct((n_pad, d_pad), jnp.float32),
            jax.ShapeDtypeStruct((n_pad, lat_pad), jnp.float32),
            jax.ShapeDtypeStruct((n_pad, lat_pad), jnp.float32),
        ),
        grid=grid,
        in_specs=in_specs,
        out_specs=out_specs,
        compiler_params=pltpu.CompilerParams(
            dimension_semantics=("parallel",),   # shards batch tiles across TCs on v7x
            vmem_limit_bytes=vmem_limit),
    )(x_p, eps_p, *wparams)

    x_hat = out_p[:n, :d].reshape(n, c, h, w)
    return [x_hat, mu_p[:n, :latent], lv_p[:n, :latent]]


def init_params(key, d, hidden, latent):
    """Deterministic parameter init (shapes implied by the module structure)."""
    ks = jax.random.split(key, 6)

    def lin(k, fan_in, fan_out):
        scale = 1.0 / jnp.sqrt(jnp.float32(fan_in))
        w = jax.random.uniform(k, (fan_in, fan_out), jnp.float32, -scale, scale)
        b = jnp.zeros((1, fan_out), jnp.float32)
        return w, b

    we1, be1 = lin(ks[0], d, hidden)        # encoder layer 1
    we2, be2 = lin(ks[1], hidden, latent)   # encoder layer 2 -> codes
    wmu, bmu = lin(ks[2], latent, latent)   # GaussianLayer mu head
    wlv, blv = lin(ks[3], latent, latent)   # GaussianLayer logvar head
    wd1, bd1 = lin(ks[4], latent, hidden)   # decoder layer 1
    wd2, bd2 = lin(ks[5], hidden, d)        # decoder layer 2 -> logits
    return (we1, be1, we2, be2, wmu, bmu, wlv, blv, wd1, bd1, wd2, bd2)


def reference_forward(x_nchw, eps, params, *, activate=False):
    """Pure-JAX (f32, unfolded) reference of the same forward."""
    (we1, be1, we2, be2, wmu, bmu, wlv, blv, wd1, bd1, wd2, bd2) = params
    n = x_nchw.shape[0]
    x = x_nchw.reshape(n, -1).astype(jnp.float32)
    h1 = jnp.maximum(x @ we1 + be1, 0.0)
    codes = h1 @ we2 + be2
    mu = codes @ wmu + bmu
    lv = codes @ wlv + blv
    z = mu + eps * jnp.exp(0.5 * lv)
    h2 = jnp.maximum(z @ wd1 + bd1, 0.0)
    out = h2 @ wd2 + bd2
    if activate:
        out = jax.nn.sigmoid(out)
    return out.reshape(x_nchw.shape), mu, lv


def _check(x, eps, params, *, activate, tile_n):
    x_hat, mu, logvar = vae_forward(x, eps, params, activate=activate, tile_n=tile_n)
    jax.block_until_ready((x_hat, mu, logvar))
    ref_out, ref_mu, ref_lv = reference_forward(x, eps, params, activate=activate)
    assert x_hat.shape == x.shape
    assert mu.shape == ref_mu.shape and logvar.shape == ref_lv.shape
    # bf16 big matmuls + folded heads vs f32 reference -> relaxed tolerances.
    assert jnp.allclose(mu, ref_mu, atol=2e-2, rtol=2e-2)
    assert jnp.allclose(logvar, ref_lv, atol=2e-2, rtol=2e-2)
    assert jnp.allclose(x_hat, ref_out, atol=3e-2, rtol=3e-2)


if __name__ == "__main__":
    # Small shapes consistent with the module: NCHW image input, latent_size=8.
    N, C, H, W = 2, 4, 16, 16
    D = C * H * W
    HIDDEN = 32
    LATENT = 8

    root = jax.random.PRNGKey(0)
    k_x, k_eps, k_p, k_x2, k_eps2 = jax.random.split(root, 5)

    x = jax.random.uniform(k_x, (N, C, H, W), jnp.float32)      # image-like input
    eps = jax.random.normal(k_eps, (N, LATENT), jnp.float32)    # reparam noise
    params = init_params(k_p, D, HIDDEN, LATENT)

    # Default forward (activate=False) and the sigmoid-activated decode path.
    _check(x, eps, params, activate=False, tile_n=128)
    _check(x, eps, params, activate=True, tile_n=128)

    # Exercise the multi-step batch grid (resident weights + pipelined tiles).
    N2 = 20
    x2 = jax.random.uniform(k_x2, (N2, C, H, W), jnp.float32)
    eps2 = jax.random.normal(k_eps2, (N2, LATENT), jnp.float32)
    _check(x2, eps2, params, activate=False, tile_n=8)

    print("KERNEL_OK")
</pallas_src>

<mosaic_0001>
module attributes {stable_mosaic.version = 11 : i64} {
  func.func @_vae_forward_kernel(%arg0: i32, %arg1: memref<8x1024xbf16, #tpu.memory_space<vmem>>, %arg2: memref<8x128xf32, #tpu.memory_space<vmem>>, %arg3: memref<1024x128xbf16, #tpu.memory_space<vmem>>, %arg4: memref<1x128xf32, #tpu.memory_space<vmem>>, %arg5: memref<128x256xf32, #tpu.memory_space<vmem>>, %arg6: memref<1x256xf32, #tpu.memory_space<vmem>>, %arg7: memref<128x128xf32, #tpu.memory_space<vmem>>, %arg8: memref<1x128xf32, #tpu.memory_space<vmem>>, %arg9: memref<128x1024xbf16, #tpu.memory_space<vmem>>, %arg10: memref<1x1024xf32, #tpu.memory_space<vmem>>, %arg11: memref<8x1024xf32, #tpu.memory_space<vmem>>, %arg12: memref<8x128xf32, #tpu.memory_space<vmem>>, %arg13: memref<8x128xf32, #tpu.memory_space<vmem>>) attributes {dimension_semantics = [#tpu.dimension_semantics<parallel>], iteration_bounds = array<i64: 1>, scalar_prefetch = 0 : i64, scratch_operands = 0 : i64, tpu.core_type = #tpu.core_type<tc>, window_params = [{transform_indices = @transform_0, window_bounds = array<i64: 8, 1024>}, {transform_indices = @transform_1, window_bounds = array<i64: 8, 128>}, {pipeline_mode = #tpu.pipeline_mode<synchronous>, transform_indices = @transform_2, window_bounds = array<i64: 1024, 128>}, {pipeline_mode = #tpu.pipeline_mode<synchronous>, transform_indices = @transform_3, window_bounds = array<i64: 1, 128>}, {pipeline_mode = #tpu.pipeline_mode<synchronous>, transform_indices = @transform_4, window_bounds = array<i64: 128, 256>}, {pipeline_mode = #tpu.pipeline_mode<synchronous>, transform_indices = @transform_5, window_bounds = array<i64: 1, 256>}, {pipeline_mode = #tpu.pipeline_mode<synchronous>, transform_indices = @transform_6, window_bounds = array<i64: 128, 128>}, {pipeline_mode = #tpu.pipeline_mode<synchronous>, transform_indices = @transform_7, window_bounds = array<i64: 1, 128>}, {pipeline_mode = #tpu.pipeline_mode<synchronous>, transform_indices = @transform_8, window_bounds = array<i64: 128, 1024>}, {pipeline_mode = #tpu.pipeline_mode<synchronous>, transform_indices = @transform_9, window_bounds = array<i64: 1, 1024>}, {transform_indices = @transform_10, window_bounds = array<i64: 8, 1024>}, {transform_indices = @transform_11, window_bounds = array<i64: 8, 128>}, {transform_indices = @transform_12, window_bounds = array<i64: 8, 128>}]} {
    %c0 = arith.constant 0 : index
    %c0_0 = arith.constant 0 : index
    %0 = vector.load %arg1[%c0, %c0_0] : memref<8x1024xbf16, #tpu.memory_space<vmem>>, vector<8x1024xbf16>
    %c0_1 = arith.constant 0 : index
    %c0_2 = arith.constant 0 : index
    %1 = vector.load %arg3[%c0_1, %c0_2] : memref<1024x128xbf16, #tpu.memory_space<vmem>>, vector<1024x128xbf16>
    %cst = arith.constant dense<0.000000e+00> : vector<8x128xf32>
    %2 = tpu.matmul %0, %1, %cst {dimension_numbers = #tpu.dot_dimension_numbers<[1], [0], [0], [1], [0, 0, 1, 1], [], []>} : vector<8x1024xbf16>, vector<1024x128xbf16>, vector<8x128xf32> -> vector<8x128xf32>
    %c0_3 = arith.constant 0 : index
    %c0_4 = arith.constant 0 : index
    %3 = vector.load %arg4[%c0_3, %c0_4] : memref<1x128xf32, #tpu.memory_space<vmem>>, vector<1x128xf32>
    %4 = vector.broadcast %3 : vector<1x128xf32> to vector<8x128xf32>
    %5 = arith.addf %2, %4 : vector<8x128xf32>
    %cst_5 = arith.constant 0.000000e+00 : f32
    %6 = vector.broadcast %cst_5 : f32 to vector<8x128xf32>
    %7 = arith.maximumf %5, %6 : vector<8x128xf32>
    %c0_6 = arith.constant 0 : index
    %c0_7 = arith.constant 0 : index
    %8 = vector.load %arg5[%c0_6, %c0_7] : memref<128x256xf32, #tpu.memory_space<vmem>>, vector<128x256xf32>
    %cst_8 = arith.constant dense<0.000000e+00> : vector<8x256xf32>
    %9 = tpu.matmul %7, %8, %cst_8 {dimension_numbers = #tpu.dot_dimension_numbers<[1], [0], [0], [1], [0, 0, 1, 1], [], []>} : vector<8x128xf32>, vector<128x256xf32>, vector<8x256xf32> -> vector<8x256xf32>
    %c0_9 = arith.constant 0 : index
    %c0_10 = arith.constant 0 : index
    %10 = vector.load %arg6[%c0_9, %c0_10] : memref<1x256xf32, #tpu.memory_space<vmem>>, vector<1x256xf32>
    %11 = vector.broadcast %10 : vector<1x256xf32> to vector<8x256xf32>
    %12 = arith.addf %9, %11 : vector<8x256xf32>
    %13 = vector.extract_strided_slice %12 {offsets = [0, 0], sizes = [8, 128], strides = [1, 1]} : vector<8x256xf32> to vector<8x128xf32>
    %14 = vector.extract_strided_slice %12 {offsets = [0, 128], sizes = [8, 128], strides = [1, 1]} : vector<8x256xf32> to vector<8x128xf32>
    %c0_11 = arith.constant 0 : index
    %c0_12 = arith.constant 0 : index
    %15 = vector.load %arg2[%c0_11, %c0_12] : memref<8x128xf32, #tpu.memory_space<vmem>>, vector<8x128xf32>
    %cst_13 = arith.constant 5.000000e-01 : f32
    %16 = vector.broadcast %cst_13 : f32 to vector<8x128xf32>
    %17 = arith.mulf %16, %14 : vector<8x128xf32>
    %18 = math.exp %17 : vector<8x128xf32>
    %19 = arith.mulf %15, %18 : vector<8x128xf32>
    %20 = arith.addf %13, %19 : vector<8x128xf32>
    %c0_14 = arith.constant 0 : index
    %c0_15 = arith.constant 0 : index
    %21 = vector.load %arg7[%c0_14, %c0_15] : memref<128x128xf32, #tpu.memory_space<vmem>>, vector<128x128xf32>
    %cst_16 = arith.constant dense<0.000000e+00> : vector<8x128xf32>
    %22 = tpu.matmul %20, %21, %cst_16 {dimension_numbers = #tpu.dot_dimension_numbers<[1], [0], [0], [1], [0, 0, 1, 1], [], []>} : vector<8x128xf32>, vector<128x128xf32>, vector<8x128xf32> -> vector<8x128xf32>
    %c0_17 = arith.constant 0 : index
    %c0_18 = arith.constant 0 : index
    %23 = vector.load %arg8[%c0_17, %c0_18] : memref<1x128xf32, #tpu.memory_space<vmem>>, vector<1x128xf32>
    %24 = vector.broadcast %23 : vector<1x128xf32> to vector<8x128xf32>
    %25 = arith.addf %22, %24 : vector<8x128xf32>
    %cst_19 = arith.constant 0.000000e+00 : f32
    %26 = vector.broadcast %cst_19 : f32 to vector<8x128xf32>
    %27 = arith.maximumf %25, %26 : vector<8x128xf32>
    %28 = arith.truncf %27 : vector<8x128xf32> to vector<8x128xbf16>
    %c0_20 = arith.constant 0 : index
    %c0_21 = arith.constant 0 : index
    %29 = vector.load %arg9[%c0_20, %c0_21] : memref<128x1024xbf16, #tpu.memory_space<vmem>>, vector<128x1024xbf16>
    %cst_22 = arith.constant dense<0.000000e+00> : vector<8x1024xf32>
    %30 = tpu.matmul %28, %29, %cst_22 {dimension_numbers = #tpu.dot_dimension_numbers<[1], [0], [0], [1], [0, 0, 1, 1], [], []>} : vector<8x128xbf16>, vector<128x1024xbf16>, vector<8x1024xf32> -> vector<8x1024xf32>
    %c0_23 = arith.constant 0 : index
    %c0_24 = arith.constant 0 : index
    %31 = vector.load %arg10[%c0_23, %c0_24] : memref<1x1024xf32, #tpu.memory_space<vmem>>, vector<1x1024xf32>
    %32 = vector.broadcast %31 : vector<1x1024xf32> to vector<8x1024xf32>
    %33 = arith.addf %30, %32 : vector<8x1024xf32>
    %c0_25 = arith.constant 0 : index
    %c0_26 = arith.constant 0 : index
    %34 = vector.load %arg11[%c0_25, %c0_26] : memref<8x1024xf32, #tpu.memory_space<vmem>>, vector<8x1024xf32>
    tpu.vector_store %arg11[%c0_25, %c0_26], %33 {strides = array<i32>} : memref<8x1024xf32, #tpu.memory_space<vmem>>, vector<8x1024xf32>,
    %c0_27 = arith.constant 0 : index
    %c0_28 = arith.constant 0 : index
    %35 = vector.load %arg12[%c0_27, %c0_28] : memref<8x128xf32, #tpu.memory_space<vmem>>, vector<8x128xf32>
    tpu.vector_store %arg12[%c0_27, %c0_28], %13 {strides = array<i32>} : memref<8x128xf32, #tpu.memory_space<vmem>>, vector<8x128xf32>,
    %c0_29 = arith.constant 0 : index
    %c0_30 = arith.constant 0 : index
    %36 = vector.load %arg13[%c0_29, %c0_30] : memref<8x128xf32, #tpu.memory_space<vmem>>, vector<8x128xf32>
    tpu.vector_store %arg13[%c0_29, %c0_30], %14 {strides = array<i32>} : memref<8x128xf32, #tpu.memory_space<vmem>>, vector<8x128xf32>,
    return
  }
  func.func @transform_0(%arg0: i32) -> (i32, i32) {
    %c0_i32 = arith.constant 0 : i32
    %c0_i32_0 = arith.constant 0 : i32
    return %arg0, %c0_i32 : i32, i32
  }
  func.func @transform_1(%arg0: i32) -> (i32, i32) {
    %c0_i32 = arith.constant 0 : i32
    %c0_i32_0 = arith.constant 0 : i32
    return %arg0, %c0_i32 : i32, i32
  }
  func.func @transform_2(%arg0: i32) -> (i32, i32) {
    %c0_i32 = arith.constant 0 : i32
    %c0_i32_0 = arith.constant 0 : i32
    %c0_i32_1 = arith.constant 0 : i32
    return %c0_i32, %c0_i32_0 : i32, i32
  }
  func.func @transform_3(%arg0: i32) -> (i32, i32) {
    %c0_i32 = arith.constant 0 : i32
    %c0_i32_0 = arith.constant 0 : i32
    %c0_i32_1 = arith.constant 0 : i32
    return %c0_i32, %c0_i32_0 : i32, i32
  }
  func.func @transform_4(%arg0: i32) -> (i32, i32) {
    %c0_i32 = arith.constant 0 : i32
    %c0_i32_0 = arith.constant 0 : i32
    %c0_i32_1 = arith.constant 0 : i32
    return %c0_i32, %c0_i32_0 : i32, i32
  }
  func.func @transform_5(%arg0: i32) -> (i32, i32) {
    %c0_i32 = arith.constant 0 : i32
    %c0_i32_0 = arith.constant 0 : i32
    %c0_i32_1 = arith.constant 0 : i32
    return %c0_i32, %c0_i32_0 : i32, i32
  }
  func.func @transform_6(%arg0: i32) -> (i32, i32) {
    %c0_i32 = arith.constant 0 : i32
    %c0_i32_0 = arith.constant 0 : i32
    %c0_i32_1 = arith.constant 0 : i32
    return %c0_i32, %c0_i32_0 : i32, i32
  }
  func.func @transform_7(%arg0: i32) -> (i32, i32) {
    %c0_i32 = arith.constant 0 : i32
    %c0_i32_0 = arith.constant 0 : i32
    %c0_i32_1 = arith.constant 0 : i32
    return %c0_i32, %c0_i32_0 : i32, i32
  }
  func.func @transform_8(%arg0: i32) -> (i32, i32) {
    %c0_i32 = arith.constant 0 : i32
    %c0_i32_0 = arith.constant 0 : i32
    %c0_i32_1 = arith.constant 0 : i32
    return %c0_i32, %c0_i32_0 : i32, i32
  }
  func.func @transform_9(%arg0: i32) -> (i32, i32) {
    %c0_i32 = arith.constant 0 : i32
    %c0_i32_0 = arith.constant 0 : i32
    %c0_i32_1 = arith.constant 0 : i32
    return %c0_i32, %c0_i32_0 : i32, i32
  }
  func.func @transform_10(%arg0: i32) -> (i32, i32) {
    %c0_i32 = arith.constant 0 : i32
    %c0_i32_0 = arith.constant 0 : i32
    return %arg0, %c0_i32 : i32, i32
  }
  func.func @transform_11(%arg0: i32) -> (i32, i32) {
    %c0_i32 = arith.constant 0 : i32
    %c0_i32_0 = arith.constant 0 : i32
    return %arg0, %c0_i32 : i32, i32
  }
  func.func @transform_12(%arg0: i32) -> (i32, i32) {
    %c0_i32 = arith.constant 0 : i32
    %c0_i32_0 = arith.constant 0 : i32
    return %arg0, %c0_i32 : i32, i32
  }
}

</mosaic_0001>

<bundles_post_ra>
// kernel: tpu_custom_call.1
= control target key start
LH: loop header
LB: loop body
LE: loop exit
PB: predicated region body
PF: predicated region fallthrough
CT: control target
= control target key end

     0   :  { %18 = vsyncpa [#allocation3], 0  ;;  %s2594_s0 = inlined_call_operand.hbm [shape: bf16[8,1024], index: 0, kind: input, shape index: {}]   ;;  %s2595_s1 = inlined_call_operand.hbm [shape: f32[8,128], index: 1, kind: input, shape index: {}]   ;;  %s2596_s2 = inlined_call_operand.hbm [shape: bf16[1024,128], index: 2, kind: input, shape index: {}]   ;;  %s2597_s3 = inlined_call_operand.vmem [shape: f32[1,128], index: 3, kind: input, shape index: {}]   ;;  %s2598_s4 = inlined_call_operand.hbm [shape: f32[128,256], index: 4, kind: input, shape index: {}]   ;;  %s2599_s5 = inlined_call_operand.vmem [shape: f32[1,256], index: 5, kind: input, shape index: {}]   ;;  %s2600_s6 = inlined_call_operand.hbm [shape: f32[128,128], index: 6, kind: input, shape index: {}]   ;;  %s2601_s7 = inlined_call_operand.vmem [shape: f32[1,128], index: 7, kind: input, shape index: {}]   ;;  %s2602_s8 = inlined_call_operand.hbm [shape: bf16[128,1024], index: 8, kind: input, shape index: {}]   ;;  %s2603_s9 = inlined_call_operand.vmem [shape: f32[1,1024], index: 9, kind: input, shape index: {}]   ;;  %s2604_s10 = inlined_call_operand.hbm [shape: f32[8,1024], index: 10, kind: output, shape index: {0}]   ;;  %s2605_s11 = inlined_call_operand.hbm [shape: f32[8,128], index: 11, kind: output, shape index: {1}]   ;;  %s2606_s12 = inlined_call_operand.hbm [shape: f32[8,128], index: 12, kind: output, shape index: {2}]  }
   0x1   :  { %19 = vsyncpa [#allocation6], 0 }
   0x2   :  { %20 = vsyncpa [#allocation9], 0 }
   0x3   :  { %21 = vsyncpa [#allocation12], 0 }
   0x4   :  { %22 = vsyncpa [#allocation4], 0 }
   0x5   :  { %23 = vsyncpa [#allocation15], 0  ;;  %s2331_s21 = smov [#allocation5]   ;;  %s2332_s23 = smov [#allocation8]  }
   0x6   :  { %s40_s22 = sshll.u32 %s2331_s21, 4  ;;  %s63_s24 = sshll.u32 %s2332_s23, 4  ;;  %s41_s22 = int_to_ptr.vmem [resolvable:$true] %s40_s22  ;;  %s2417_s24 = int_to_ptr.vmem [resolvable:$true] %s63_s24 }
   0x7   :  { %s2121_s27 = scalar_lea.hbm %s2595_s1, 128 }
   0x8   :  { %p2122_p0 = scmp.ne.s32.totalorder %s2595_s1, %s2121_s27  ;;  %p2125_p1 = scmp.lt.u32.totalorder %s2121_s27, %s2595_s1 }
   0xa   :  { %p2127_p2 = pnand %p2125_p1, %p2122_p0 }
   0xc   :  { %2130 = shalt.err (!%p2127_p2)
}
   0xd   :  { %s2131_s14 = scalar_lea.vmem %s41_s22, 128  ;;  %p2136_p4 = scmp.lt.s32.totalorder %s41_s22, %s41_s22 }
   0xe   :  { %p2132_p3 = scmp.ne.s32.totalorder %s41_s22, %s2131_s14  ;;  %p2137_p5 = scmp.lt.s32.totalorder %s2131_s14, %s2131_s14 }
  0x10   :  { %p2138_p6 = por %p2137_p5, %p2136_p4 }
  0x12   :  { %p2139_p7 = pnand %p2138_p6, %p2132_p3 }
  0x14   :  { %2142 = shalt.err (!%p2139_p7)
}
  0x15   :  { %43 = dma.hbm_to_vmem [thread:$0]  %s2595_s1, 128, %s41_s22, [#allocation6]  }
  0x16   :  { %s2143_s19 = scalar_lea.hbm %s2598_s4, 4096 }
  0x17   :  { %p2144_p8 = scmp.ne.s32.totalorder %s2598_s4, %s2143_s19  ;;  %p2147_p9 = scmp.lt.u32.totalorder %s2143_s19, %s2598_s4 }
  0x19   :  { %p2149_p10 = pnand %p2147_p9, %p2144_p8 }
  0x1b   :  { %2152 = shalt.err (!%p2149_p10)
}
  0x1c   :  { %s2153_s26 = scalar_lea.vmem %s2417_s24, 4096  ;;  %p2158_p12 = scmp.lt.s32.totalorder %s2417_s24, %s2417_s24 }
  0x1d   :  { %p2154_p11 = scmp.ne.s32.totalorder %s2417_s24, %s2153_s26  ;;  %p2159_p13 = scmp.lt.s32.totalorder %s2153_s26, %s2153_s26 }
  0x1f   :  { %p2160_p0 = por %p2159_p13, %p2158_p12 }
  0x21   :  { %p2161_p1 = pnand %p2160_p0, %p2154_p11 }
  0x23   :  { %2164 = shalt.err (!%p2161_p1)
}
  0x24   :  { %s2333_s1 = smov 256   ;;  %s2334_s22 = smov 16  }
  0x25   :  { %69 = dma.hbm_to_vmem [thread:$0]  %s2598_s4, 4096, %s2417_s24, [#allocation9], %s2333_s1, %s2333_s1, %s2334_s22  }
  0x26   :  { %s2335_s29 = smov [#allocation2]   ;;  %s2336_s13 = smov [#allocation7]  }
  0x27   :  { %s30_s30 = sshll.u32 %s2335_s29, 4  ;;  %s49_s14 = sshll.u32 %s2336_s13, 4  ;;  %s31_s30 = int_to_ptr.vmem [resolvable:$true] %s30_s30  ;;  %s2448_s14 = int_to_ptr.vmem [resolvable:$true] %s49_s14 }
  0x28   :  { %s2165_s17 = scalar_lea.hbm %s2594_s0, 512 }
  0x29   :  { %p2166_p2 = scmp.ne.s32.totalorder %s2594_s0, %s2165_s17  ;;  %p2169_p3 = scmp.lt.u32.totalorder %s2165_s17, %s2594_s0 }
  0x2b   :  { %p2171_p4 = pnand %p2169_p3, %p2166_p2 }
  0x2d   :  { %2174 = shalt.err (!%p2171_p4)
}
  0x2e   :  { %s2175_s4 = scalar_lea.vmem %s31_s30, 512  ;;  %p2180_p6 = scmp.lt.s32.totalorder %s31_s30, %s31_s30 }
  0x2f   :  { %p2176_p5 = scmp.ne.s32.totalorder %s31_s30, %s2175_s4  ;;  %p2181_p7 = scmp.lt.s32.totalorder %s2175_s4, %s2175_s4 }
  0x31   :  { %p2182_p8 = por %p2181_p7, %p2180_p6 }
  0x33   :  { %p2183_p9 = pnand %p2182_p8, %p2176_p5 }
  0x35   :  { %2186 = shalt.err (!%p2183_p9)
}
  0x36   :  { %33 = dma.hbm_to_vmem [thread:$0]  %s2594_s0, 512, %s31_s30, [#allocation3]  }
  0x37   :  { %s2187_s1 = scalar_lea.hbm %s2596_s2, 8192 }
  0x38   :  { %p2188_p10 = scmp.ne.s32.totalorder %s2596_s2, %s2187_s1  ;;  %p2191_p11 = scmp.lt.u32.totalorder %s2187_s1, %s2596_s2 }
  0x3a   :  { %p2193_p12 = pnand %p2191_p11, %p2188_p10 }
  0x3c   :  { %2196 = shalt.err (!%p2193_p12)
}
  0x3d   :  { %s2197_s13 = scalar_lea.vmem %s2448_s14, 8192  ;;  %p2202_p0 = scmp.lt.s32.totalorder %s2448_s14, %s2448_s14 }
  0x3e   :  { %p2198_p13 = scmp.ne.s32.totalorder %s2448_s14, %s2197_s13  ;;  %p2203_p1 = scmp.lt.s32.totalorder %s2197_s13, %s2197_s13 }
  0x40   :  { %p2204_p2 = por %p2203_p1, %p2202_p0 }
  0x42   :  { %p2205_p3 = pnand %p2204_p2, %p2198_p13 }
  0x44   :  { %2208 = shalt.err (!%p2205_p3)
}
  0x45   :  { %s2337_s0 = smov 64   ;;  %s2338_s30 = smov 4  }
  0x46   :  { %55 = dma.hbm_to_vmem [thread:$0]  %s2596_s2, 8192, %s2448_s14, [#allocation6], %s2337_s0, %s2337_s0, %s2338_s30  }
  0x47   :  { %s2339_s17 = smov [#allocation10]   ;;  %s2209_s21 = scalar_lea.hbm %s2600_s6, 2048 }
  0x48   :  { %s77_s18 = sshll.u32 %s2339_s17, 4  ;;  %p2210_p4 = scmp.ne.s32.totalorder %s2600_s6, %s2209_s21  ;;  %s78_s18 = int_to_ptr.vmem [resolvable:$true] %s77_s18 }
  0x49   :  { %p2213_p5 = scmp.lt.u32.totalorder %s2209_s21, %s2600_s6 }
  0x4b   :  { %p2215_p6 = pnand %p2213_p5, %p2210_p4 }
  0x4d   :  { %2218 = shalt.err (!%p2215_p6)
}
  0x4e   :  { %s2219_s26 = scalar_lea.vmem %s78_s18, 2048  ;;  %p2224_p8 = scmp.lt.s32.totalorder %s78_s18, %s78_s18 }
  0x4f   :  { %p2220_p7 = scmp.ne.s32.totalorder %s78_s18, %s2219_s26  ;;  %p2225_p9 = scmp.lt.s32.totalorder %s2219_s26, %s2219_s26 }
  0x51   :  { %p2226_p10 = por %p2225_p9, %p2224_p8 }
  0x53   :  { %p2227_p11 = pnand %p2226_p10, %p2220_p7 }
  0x55   :  { %2230 = shalt.err (!%p2227_p11)
}
  0x56   :  { %s2340_s2 = smov 128   ;;  %s2341_s14 = smov 8  }
  0x57   :  { %83 = dma.hbm_to_vmem [thread:$0]  %s2600_s6, 2048, %s78_s18, [#allocation9], %s2340_s2, %s2340_s2, %s2341_s14  }
  0x58   :  { %s2342_s27 = smov [#allocation11]   ;;  %s2231_s0 = scalar_lea.hbm %s2602_s8, 8192 }
  0x59   :  { %s91_s28 = sshll.u32 %s2342_s27, 4  ;;  %p2232_p12 = scmp.ne.s32.totalorder %s2602_s8, %s2231_s0  ;;  %s92_s28 = int_to_ptr.vmem [resolvable:$true] %s91_s28 }
  0x5a   :  { %p2235_p13 = scmp.lt.u32.totalorder %s2231_s0, %s2602_s8 }
  0x5c   :  { %p2237_p0 = pnand %p2235_p13, %p2232_p12 }
  0x5e   :  { %2240 = shalt.err (!%p2237_p0)
}
  0x5f   :  { %s2241_s19 = scalar_lea.vmem %s92_s28, 8192  ;;  %p2246_p2 = scmp.lt.s32.totalorder %s92_s28, %s92_s28 }
  0x60   :  { %p2242_p1 = scmp.ne.s32.totalorder %s92_s28, %s2241_s19  ;;  %p2247_p3 = scmp.lt.s32.totalorder %s2241_s19, %s2241_s19 }
  0x62   :  { %p2248_p4 = por %p2247_p3, %p2246_p2 }
  0x64   :  { %p2249_p5 = pnand %p2248_p4, %p2242_p1 }
  0x66   :  { %2252 = shalt.err (!%p2249_p5)
}
  0x67   :  { %s2343_s6 = smov 512   ;;  %s2344_s18 = smov 32  }
  0x68   :  { %97 = dma.hbm_to_vmem [thread:$0]  %s2602_s8, 8192, %s92_s28, [#allocation12], %s2343_s6, %s2343_s6, %s2344_s18  }
  0x69   :  { %2319 = dma.done.wait [#allocation3], 512  }
  0x6a   :  { %2320 = vsyncadd [#allocation3], 4294966784 }
  0x6b   :  { %2321 = dma.done.wait [#allocation6], 8320  }
  0x6c   :  { %2322 = vsyncadd [#allocation6], 4294958976 }
  0x6d   :  { %2323 = dma.done.wait [#allocation9], 6144  }
  0x6e   :  { %2324 = vsyncadd [#allocation9], 4294961152 }
  0x6f   :  { %2325 = dma.done.wait [#allocation12], 8192  }
  0x70   :  { %2326 = vsyncadd [#allocation12], 4294959104  ;;  %v2047_v0 = vld [vmem:[#allocation7 + $0x40] sm:$0xff]   ;;  %v2051_v4 = vld [vmem:[#allocation7 + $0x48] sm:$0xff]   ;;  %vm2347_vm0 = vmmov 0  }
  0x71   :  { %v2048_v1 = vld [vmem:[#allocation7 + $0xc0] sm:$0xff]   ;;  %1830 = vmatprep.subr.bf16.mxu0 %v2047_v0  ;;  %v2052_v5 = vld [vmem:[#allocation7 + $0xc8] sm:$0xff]   ;;  %v2055_v8 = vld [vmem:[#allocation7 + $0x50] sm:$0xff]  }
  0x72   :  { %v2049_v2 = vld [vmem:[#allocation7] sm:$0xff]   ;;  %1852 = vmatprep.subr.bf16.mxu1 %v2048_v1  ;;  %v2053_v6 = vld [vmem:[#allocation7 + $0x8] sm:$0xff]   ;;  %v2056_v9 = vld [vmem:[#allocation7 + $0xd0] sm:$0xff]  }
  0x73   :  { %v2050_v3 = vld [vmem:[#allocation7 + $0x80] sm:$0xff]   ;;  %1831 = vmatpush3.bf16.msra.mxu0 %v2049_v2  ;;  %v2054_v7 = vld [vmem:[#allocation7 + $0x88] sm:$0xff]   ;;  %v2057_v10 = vld [vmem:[#allocation7 + $0x10] sm:$0xff]  }
  0x74   :  { %1853 = vmatpush3.bf16.msra.mxu1 %v2050_v3  ;;  %1832 = vmatprep.subr.bf16.mxu0 %v2051_v4  ;;  %v2058_v11 = vld [vmem:[#allocation7 + $0x90] sm:$0xff]   ;;  %v2059_v12 = vld [vmem:[#allocation7 + $0x58] sm:$0xff]   ;;  %v2063_v16 = vld [vmem:[#allocation7 + $0x60] sm:$0xff]  }
  0x75   :  { %1854 = vmatprep.subr.bf16.mxu1 %v2052_v5  ;;  %v2060_v13 = vld [vmem:[#allocation7 + $0xd8] sm:$0xff]   ;;  %v2064_v17 = vld [vmem:[#allocation7 + $0xe0] sm:$0xff]   ;;  %v2067_v20 = vld [vmem:[#allocation7 + $0x68] sm:$0xff]  }
  0x76   :  { %v2061_v14 = vld [vmem:[#allocation7 + $0x18] sm:$0xff]   ;;  %v2065_v18 = vld [vmem:[#allocation7 + $0x20] sm:$0xff]   ;;  %v2068_v21 = vld [vmem:[#allocation7 + $0xe8] sm:$0xff]  }
  0x77   :  { %1833 = vmatpush3.bf16.msra.mxu0 %v2053_v6  ;;  %v2062_v15 = vld [vmem:[#allocation7 + $0x98] sm:$0xff]   ;;  %v2066_v19 = vld [vmem:[#allocation7 + $0xa0] sm:$0xff]   ;;  %v2069_v22 = vld [vmem:[#allocation7 + $0x28] sm:$0xff]  }
  0x78   :  { %1855 = vmatpush3.bf16.msra.mxu1 %v2054_v7  ;;  %1834 = vmatprep.subr.bf16.mxu0 %v2055_v8  ;;  %v2070_v23 = vld [vmem:[#allocation7 + $0xa8] sm:$0xff]   ;;  %v2071_v24 = vld [vmem:[#allocation7 + $0x70] sm:$0xff]   ;;  %v2075_v28 = vld [vmem:[#allocation7 + $0x78] sm:$0xff]  }
  0x79   :  { %1856 = vmatprep.subr.bf16.mxu1 %v2056_v9  ;;  %v2072_v25 = vld [vmem:[#allocation7 + $0xf0] sm:$0xff]   ;;  %v2076_v29 = vld [vmem:[#allocation7 + $0xf8] sm:$0xff]   ;;  %v120_v33 = vld [vmem:[#allocation2 + $0x8] sm:$0xff] }
  0x7a   :  { %v2073_v26 = vld [vmem:[#allocation7 + $0x30] sm:$0xff]   ;;  %v2077_v30 = vld [vmem:[#allocation7 + $0x38] sm:$0xff]   ;;  %v1695_v36 = vcombine.low %v120_v33, %v120_v33  ;;  %v1696_v37 = vcombine.high %v120_v33, %v120_v33  ;;  %v2083_v38 = vld [vmem:[#allocation7 + $0x140] sm:$0xff]  }
  0x7b   :  { %1835 = vmatpush3.bf16.msra.mxu0 %v2057_v10  ;;  %v2074_v27 = vld [vmem:[#allocation7 + $0xb0] sm:$0xff]   ;;  %v2078_v31 = vld [vmem:[#allocation7 + $0xb8] sm:$0xff]   ;;  %v2084_v39 = vld [vmem:[#allocation7 + $0x1c0] sm:$0xff]  }
  0x7c   :  { %1857 = vmatpush3.bf16.msra.mxu1 %v2058_v11  ;;  %1836 = vmatprep.subr.bf16.mxu0 %v2059_v12  ;;  %v119_v32 = vld [vmem:[#allocation2] sm:$0xff]  ;;  %v2085_v40 = vld [vmem:[#allocation7 + $0x100] sm:$0xff]   ;;  %v2087_v42 = vld [vmem:[#allocation7 + $0x148] sm:$0xff]  }
  0x7d   :  { %1858 = vmatprep.subr.bf16.mxu1 %v2060_v13  ;;  %v1693_v34 = vcombine.low %v119_v32, %v119_v32  ;;  %v1694_v35 = vcombine.high %v119_v32, %v119_v32  ;;  %742 = vmatprep.mubr.bf16.mxu1 %v1696_v37  ;;  %v2086_v41 = vld [vmem:[#allocation7 + $0x180] sm:$0xff]   ;;  %v2088_v43 = vld [vmem:[#allocation7 + $0x1c8] sm:$0xff]   ;;  %v2091_v46 = vld [vmem:[#allocation7 + $0x150] sm:$0xff]  }
  0x7e   :  { %v2089_v44 = vld [vmem:[#allocation7 + $0x108] sm:$0xff]   ;;  %v2092_v47 = vld [vmem:[#allocation7 + $0x1d0] sm:$0xff]   ;;  %v2095_v50 = vld [vmem:[#allocation7 + $0x158] sm:$0xff]  }
  0x7f   :  { %1837 = vmatpush3.bf16.msra.mxu0 %v2061_v14  ;;  %702 = vmatprep.mubr.bf16.mxu0 %v1694_v35  ;;  %v2090_v45 = vld [vmem:[#allocation7 + $0x188] sm:$0xff]   ;;  %v2093_v48 = vld [vmem:[#allocation7 + $0x110] sm:$0xff]   ;;  %v2096_v51 = vld [vmem:[#allocation7 + $0x1d8] sm:$0xff]  }
  0x80   :  { %1859 = vmatpush3.bf16.msra.mxu1 %v2062_v15  ;;  %1838 = vmatprep.subr.bf16.mxu0 %v2063_v16  ;;  %v2094_v49 = vld [vmem:[#allocation7 + $0x190] sm:$0xff]   ;;  %v2097_v52 = vld [vmem:[#allocation7 + $0x118] sm:$0xff]   ;;  %v2099_v54 = vld [vmem:[#allocation7 + $0x160] sm:$0xff]  }
  0x81   :  { %1860 = vmatprep.subr.bf16.mxu1 %v2064_v17  ;;  %v2098_v53 = vld [vmem:[#allocation7 + $0x198] sm:$0xff]   ;;  %v2100_v55 = vld [vmem:[#allocation7 + $0x1e0] sm:$0xff]   ;;  %v2103_v58 = vld [vmem:[#allocation7 + $0x168] sm:$0xff]  }
  0x82   :  { %v2101_v56 = vld [vmem:[#allocation7 + $0x120] sm:$0xff]   ;;  %v2104_v59 = vld [vmem:[#allocation7 + $0x1e8] sm:$0xff]   ;;  %v2107_v62 = vld [vmem:[#allocation7 + $0x170] sm:$0xff]  }
  0x83   :  { %1839 = vmatpush3.bf16.msra.mxu0 %v2065_v18  ;;  %v2102_v57 = vld [vmem:[#allocation7 + $0x1a0] sm:$0xff]   ;;  %v2105_v60 = vld [vmem:[#allocation7 + $0x128] sm:$0xff]   ;;  %v2108_v63 = vld [vmem:[#allocation7 + $0x1f0] sm:$0xff]  }
  0x84   :  { %1861 = vmatpush3.bf16.msra.mxu1 %v2066_v19  ;;  %1840 = vmatprep.subr.bf16.mxu0 %v2067_v20  ;;  %v2106_v61 = vld [vmem:[#allocation7 + $0x1a8] sm:$0xff]   ;;  %v2109_v0 = vld [vmem:[#allocation7 + $0x130] sm:$0xff]   ;;  %v2111_v2 = vld [vmem:[#allocation7 + $0x178] sm:$0xff]  }
  0x85   :  { %1862 = vmatprep.subr.bf16.mxu1 %v2068_v21  ;;  %v2110_v1 = vld [vmem:[#allocation7 + $0x1b0] sm:$0xff]   ;;  %v2112_v3 = vld [vmem:[#allocation7 + $0x1f8] sm:$0xff]   ;;  %v121_v6 = vld [vmem:[#allocation2 + $0x10] sm:$0xff] }
  0x86   :  { %v2113_v4 = vld [vmem:[#allocation7 + $0x138] sm:$0xff]   ;;  %v1697_v7 = vcombine.low %v121_v6, %v121_v6  ;;  %v1698_v8 = vcombine.high %v121_v6, %v121_v6  ;;  %v122_v9 = vld [vmem:[#allocation2 + $0x18] sm:$0xff]  ;;  %v832_v12 = vld [vmem:[#allocation8 + $0x8] sm:$0xff] }
  0x87   :  { %1841 = vmatpush3.bf16.msra.mxu0 %v2069_v22  ;;  %v2114_v5 = vld [vmem:[#allocation7 + $0x1b8] sm:$0xff]   ;;  %v1699_v10 = vcombine.low %v122_v9, %v122_v9  ;;  %v1700_v11 = vcombine.high %v122_v9, %v122_v9  ;;  %v831_v14 = vld [vmem:[#allocation8] sm:$0xff]  ;;  %v833_v16 = vld [vmem:[#allocation8 + $0x10] sm:$0xff] }
  0x88   :  { %1863 = vmatpush3.bf16.msra.mxu1 %v2070_v23  ;;  %1842 = vmatprep.subr.bf16.mxu0 %v2071_v24  ;;  %v834_v13 = vld [vmem:[#allocation8 + $0x18] sm:$0xff]  ;;  %v836_v17 = vld [vmem:[#allocation8 + $0x28] sm:$0xff]  ;;  %v1972_v19 = vpack.c.bf16 %v833_v16, %v831_v14  ;;  %v835_v21 = vld [vmem:[#allocation8 + $0x20] sm:$0xff] }
  0x89   :  { %1864 = vmatprep.subr.bf16.mxu1 %v2072_v25  ;;  %v1970_v15 = vpack.c.bf16 %v834_v13, %v832_v12  ;;  %v838_v18 = vld [vmem:[#allocation8 + $0x38] sm:$0xff]  ;;  %v837_v22 = vld [vmem:[#allocation8 + $0x30] sm:$0xff]  ;;  %v840_v23 = vld [vmem:[#allocation8 + $0x48] sm:$0xff] }
  0x8a   :  { %v1974_v20 = vpack.c.bf16 %v838_v18, %v836_v17  ;;  %v842_v24 = vld [vmem:[#allocation8 + $0x58] sm:$0xff]  ;;  %v1976_v25 = vpack.c.bf16 %v837_v22, %v835_v21  ;;  %v843_v33 = vld [vmem:[#allocation8 + $0x60] sm:$0xff]  ;;  %v848_v35 = vld [vmem:[#allocation8 + $0x88] sm:$0xff] }
  0x8b   :  { %1843 = vmatpush3.bf16.msra.mxu0 %v2073_v26  ;;  %v1978_v26 = vpack.c.bf16 %v842_v24, %v840_v23  ;;  %v1692_v6 = vld [vmem:[%s2597_s3] ss:$0 sm:$0xff] }
  0x8c   :  { %1865 = vmatpush3.bf16.msra.mxu1 %v2074_v27  ;;  %1844 = vmatprep.subr.bf16.mxu0 %v2075_v28  ;;  %v839_v27 = vld [vmem:[#allocation8 + $0x40] sm:$0xff]  ;;  %v841_v28 = vld [vmem:[#allocation8 + $0x50] sm:$0xff] }
  0x8d   :  { %1866 = vmatprep.subr.bf16.mxu1 %v2076_v29  ;;  %v844_v29 = vld [vmem:[#allocation8 + $0x68] sm:$0xff] }
  0x8f   :  { %1845 = vmatpush3.bf16.msra.mxu0 %v2077_v30  ;;  %v846_v30 = vld [vmem:[#allocation8 + $0x78] sm:$0xff] }
  0x90   :  { %1867 = vmatpush3.bf16.msra.mxu1 %v2078_v31  ;;  %1874 = vmatprep.subr.bf16.mxu0 %v2083_v38  ;;  %v1980_v31 = vpack.c.bf16 %v841_v28, %v839_v27  ;;  %v1982_v32 = vpack.c.bf16 %v846_v30, %v844_v29  ;;  %v956_v30 = vld [vmem:[#allocation10 + $0x20] sm:$0xff] }
  0x91   :  { %1896 = vmatprep.subr.bf16.mxu1 %v2084_v39  ;;  %v847_v39 = vld [vmem:[#allocation8 + $0x80] sm:$0xff] }
  0x92   :  { %703 = vmatmul.mubr.bf16.vlgmr.msra.gmra.mrb[0].mxu0 %v1693_v34  ;;  %v845_v34 = vld [vmem:[#allocation8 + $0x70] sm:$0xff] }
  0x93   :  { %743 = vmatmul.mubr.bf16.vlgmr.msra.gmra.mrb[0].mxu1 %v1695_v36  ;;  %1875 = vmatpush3.bf16.msra.mxu0 %v2085_v40  ;;  %v850_v36 = vld [vmem:[#allocation8 + $0x98] sm:$0xff]  ;;  %v1984_v37 = vpack.c.bf16 %v845_v34, %v843_v33  ;;  %v849_v40 = vld [vmem:[#allocation8 + $0x90] sm:$0xff] }
  0x94   :  { %1897 = vmatpush3.bf16.msra.mxu1 %v2086_v41  ;;  %1876 = vmatprep.subr.bf16.mxu0 %v2087_v42  ;;  %v1986_v38 = vpack.c.bf16 %v850_v36, %v848_v35  ;;  %v852_v41 = vld [vmem:[#allocation8 + $0xa8] sm:$0xff]  ;;  %v854_v42 = vld [vmem:[#allocation8 + $0xb8] sm:$0xff]  ;;  %v958_v33 = vld [vmem:[#allocation10 + $0x30] sm:$0xff] }
  0x95   :  { %1898 = vmatprep.subr.bf16.mxu1 %v2088_v43  ;;  %782 = vmatprep.mubr.bf16.mxu0 %v1698_v8  ;;  %v1988_v43 = vpack.c.bf16 %v849_v40, %v847_v39  ;;  %v959_v34 = vld [vmem:[#allocation10 + $0x38] sm:$0xff]  ;;  %v960_v36 = vld [vmem:[#allocation10 + $0x40] sm:$0xff]  ;;  %v962_v39 = vld [vmem:[#allocation10 + $0x50] sm:$0xff] }
  0x96   :  { %822 = vmatprep.mubr.bf16.mxu1 %v1700_v11  ;;  %v2012_v35 = vpack.c.bf16 %v959_v34, %v958_v33  ;;  %v963_v40 = vld [vmem:[#allocation10 + $0x58] sm:$0xff] }
  0x97   :  { %1877 = vmatpush3.bf16.msra.mxu0 %v2089_v44  ;;  %v1990_v44 = vpack.c.bf16 %v854_v42, %v852_v41  ;;  %v2018_v41 = vpack.c.bf16 %v963_v40, %v962_v39  ;;  %v964_v42 = vld [vmem:[#allocation10 + $0x60] sm:$0xff]  ;;  %v1072_v40 = vld [vmem:[#allocation11 + $0xc8] sm:$0xff] }
  0x98   :  { %1899 = vmatpush3.bf16.msra.mxu1 %v2090_v45  ;;  %1878 = vmatprep.subr.bf16.mxu0 %v2091_v46  ;;  %v851_v45 = vld [vmem:[#allocation8 + $0xa0] sm:$0xff]  ;;  %v853_v46 = vld [vmem:[#allocation8 + $0xb0] sm:$0xff] }
  0x99   :  { %1900 = vmatprep.subr.bf16.mxu1 %v2092_v47  ;;  %v1992_v47 = vpack.c.bf16 %v853_v46, %v851_v45  ;;  %v966_v45 = vld [vmem:[#allocation10 + $0x70] sm:$0xff]  ;;  %v967_v46 = vld [vmem:[#allocation10 + $0x78] sm:$0xff] }
  0x9b   :  { %1879 = vmatpush3.bf16.msra.mxu0 %v2093_v48  ;;  %v856_v48 = vld [vmem:[#allocation8 + $0xc8] sm:$0xff] }
  0x9c   :  { %1901 = vmatpush3.bf16.msra.mxu1 %v2094_v49  ;;  %1880 = vmatprep.subr.bf16.mxu0 %v2095_v50  ;;  %v858_v49 = vld [vmem:[#allocation8 + $0xd8] sm:$0xff] }
  0x9d   :  { %1902 = vmatprep.subr.bf16.mxu1 %v2096_v51  ;;  %v1994_v50 = vpack.c.bf16 %v858_v49, %v856_v48  ;;  %v855_v51 = vld [vmem:[#allocation8 + $0xc0] sm:$0xff] }
  0x9e   :  { %v1047_v48 = vld [vmem:[#allocation11] sm:$0xff] }
  0x9f   :  { %1881 = vmatpush3.bf16.msra.mxu0 %v2097_v52  ;;  %v857_v52 = vld [vmem:[#allocation8 + $0xd0] sm:$0xff]  ;;  %v1051_v49 = vld [vmem:[#allocation11 + $0x20] sm:$0xff] }
  0xa0   :  { %1903 = vmatpush3.bf16.msra.mxu1 %v2098_v53  ;;  %1882 = vmatprep.subr.bf16.mxu0 %v2099_v54  ;;  %v1996_v53 = vpack.c.bf16 %v857_v52, %v855_v51  ;;  %v860_v54 = vld [vmem:[#allocation8 + $0xe8] sm:$0xff]  ;;  %v1766_v51 = vcombine.low %v1047_v48, %v1051_v49  ;;  %v1767_v52 = vcombine.high %v1047_v48, %v1051_v49 }
  0xa1   :  { %1904 = vmatprep.subr.bf16.mxu1 %v2100_v55  ;;  %v862_v55 = vld [vmem:[#allocation8 + $0xf8] sm:$0xff]  ;;  %v1088_v48 = vld [vmem:[#allocation11 + $0x148] sm:$0xff] }
  0xa2   :  { %v1092_v49 = vld [vmem:[#allocation11 + $0x168] sm:$0xff] }
  0xa3   :  { %1883 = vmatpush3.bf16.msra.mxu0 %v2101_v56  ;;  %v1998_v56 = vpack.c.bf16 %v862_v55, %v860_v54  ;;  %v1055_v54 = vld [vmem:[#allocation11 + $0x40] sm:$0xff] }
  0xa4   :  { %1905 = vmatpush3.bf16.msra.mxu1 %v2102_v57  ;;  %1884 = vmatprep.subr.bf16.mxu0 %v2103_v58  ;;  %v859_v57 = vld [vmem:[#allocation8 + $0xe0] sm:$0xff]  ;;  %v861_v58 = vld [vmem:[#allocation8 + $0xf0] sm:$0xff] }
  0xa5   :  { %1906 = vmatprep.subr.bf16.mxu1 %v2104_v59  ;;  %v2000_v59 = vpack.c.bf16 %v861_v58, %v859_v57  ;;  %v1059_v55 = vld [vmem:[#allocation11 + $0x60] sm:$0xff] }
  0xa6   :  { %v1775_v58 = vcombine.high %v1055_v54, %v1059_v55 }
  0xa7   :  { %1885 = vmatpush3.bf16.msra.mxu0 %v2105_v60  ;;  %v2345_v60 = vmov 0.0  }
  0xa8   :  { %1907 = vmatpush3.bf16.msra.mxu1 %v2106_v61  ;;  %1886 = vmatprep.subr.bf16.mxu0 %v2107_v62  ;;  %v952_v61 = vld [vmem:[#allocation10] sm:$0xff]  ;;  %v953_v62 = vld [vmem:[#allocation10 + $0x8] sm:$0xff] }
  0xa9   :  { %1908 = vmatprep.subr.bf16.mxu1 %v2108_v63  ;;  %v954_v63 = vld [vmem:[#allocation10 + $0x10] sm:$0xff] }
  0xab   :  { %1887 = vmatpush3.bf16.msra.mxu0 %v2109_v0  ;;  %v2346_v0 = vmov 0.0|0.0  }
  0xac   :  { %1909 = vmatpush3.bf16.msra.mxu1 %v2110_v1  ;;  %1888 = vmatprep.subr.bf16.mxu0 %v2111_v2  ;;  %v2003_v1 = vpack.c.bf16 %v953_v62, %v952_v61  ;;  %v955_v2 = vld [vmem:[#allocation10 + $0x18] sm:$0xff]  ;;  %v1067_v61 = vld [vmem:[#allocation11 + $0xa0] sm:$0xff] }
  0xad   :  { %1910 = vmatprep.subr.bf16.mxu1 %v2112_v3  ;;  %v2006_v3 = vpack.c.bf16 %v955_v2, %v954_v63 }
  0xaf   :  { %1889 = vmatpush3.bf16.msra.mxu0 %v2113_v4 }
  0xb0   :  { %1911 = vmatpush3.bf16.msra.mxu1 %v2114_v5  ;;  %1971 = vmatprep.subr.bf16.mxu0 %v1970_v15 }
  0xb1   :  { %2002 = vmatprep.subr.bf16.mxu1 %v2346_v0 }
  0xb2   :  { %783 = vmatmul.mubr.bf16.vlgmr.msra.gmra.mrb[4].mxu0 %v1697_v7 }
  0xb3   :  { %823 = vmatmul.mubr.bf16.vlgmr.msra.gmra.mrb[4].mxu1 %v1699_v10  ;;  %1973 = vmatpush1.bf16.msra.mxu0 %v1972_v19 }
  0xb4   :  { %1975 = vmatprep.subr.bf16.mxu0 %v1974_v20  ;;  %939 = vmatprep.mubr.f32.mxu0 %v2345_v60 }
  0xb5   :  { %2004 = vmatpush3.bf16.msra.mxu1 %v2003_v1  ;;  %1967 = vmatprep.mubr.msk.f32.mxu1 %vm2347_vm0, %v2345_v60  ;;  %v1063_v60 = vld [vmem:[#allocation11 + $0x80] sm:$0xff] }
  0xb6   :  { %2005 = vmatprep.subr.bf16.mxu1 %v2346_v0  ;;  %v1783_v62 = vcombine.high %v1063_v60, %v1067_v61  ;;  %v1782_v63 = vcombine.low %v1063_v60, %v1067_v61  ;;  %v1075_v1 = vld [vmem:[#allocation11 + $0xe0] sm:$0xff]  ;;  %v1108_v61 = vld [vmem:[#allocation11 + $0x1e8] sm:$0xff] }
  0xb7   :  { %1977 = vmatpush1.bf16.msra.mxu0 %v1976_v25 }
  0xb8   :  { %1979 = vmatprep.subr.bf16.mxu0 %v1978_v26 }
  0xb9   :  { %2007 = vmatpush3.bf16.msra.mxu1 %v2006_v3 }
  0xba   :  { %2008 = vmatprep.subr.bf16.mxu1 %v2346_v0 }
  0xbb   :  { %1981 = vmatpush1.bf16.msra.mxu0 %v1980_v31  ;;  %v957_v31 = vld [vmem:[#allocation10 + $0x28] sm:$0xff] }
  0xbc   :  { %1983 = vmatprep.subr.bf16.mxu0 %v1982_v32  ;;  %v2009_v32 = vpack.c.bf16 %v957_v31, %v956_v30  ;;  %v1056_v31 = vld [vmem:[#allocation11 + $0x48] sm:$0xff] }
  0xbe   :  { %2010 = vmatpush3.bf16.msra.mxu1 %v2009_v32  ;;  %v1060_v32 = vld [vmem:[#allocation11 + $0x68] sm:$0xff] }
  0xbf   :  { %1985 = vmatpush1.bf16.msra.mxu0 %v1984_v37  ;;  %2011 = vmatprep.subr.bf16.mxu1 %v2346_v0  ;;  %v961_v37 = vld [vmem:[#allocation10 + $0x48] sm:$0xff] }
  0xc0   :  { %1987 = vmatprep.subr.bf16.mxu0 %v1986_v38  ;;  %v2015_v38 = vpack.c.bf16 %v961_v37, %v960_v36  ;;  %v1064_v36 = vld [vmem:[#allocation11 + $0x88] sm:$0xff] }
  0xc1   :  { %v1068_v37 = vld [vmem:[#allocation11 + $0xa8] sm:$0xff] }
  0xc2   :  { %2013 = vmatpush3.bf16.msra.mxu1 %v2012_v35  ;;  %v1777_v35 = vcombine.high %v1056_v31, %v1060_v32  ;;  %v1785_v39 = vcombine.high %v1064_v36, %v1068_v37 }
  0xc3   :  { %1989 = vmatpush1.bf16.msra.mxu0 %v1988_v43  ;;  %2014 = vmatprep.subr.bf16.mxu1 %v2346_v0  ;;  %v965_v43 = vld [vmem:[#allocation10 + $0x68] sm:$0xff] }
  0xc4   :  { %1991 = vmatprep.subr.bf16.mxu0 %v1990_v44  ;;  %v2021_v44 = vpack.c.bf16 %v965_v43, %v964_v42  ;;  %v1784_v42 = vcombine.low %v1064_v36, %v1068_v37  ;;  %v1078_v36 = vld [vmem:[#allocation11 + $0xf8] sm:$0xff] }
  0xc6   :  { %2016 = vmatpush3.bf16.msra.mxu1 %v2015_v38  ;;  %v1776_v38 = vcombine.low %v1056_v31, %v1060_v32 }
  0xc7   :  { %1993 = vmatpush1.bf16.msra.mxu0 %v1992_v47  ;;  %2017 = vmatprep.subr.bf16.mxu1 %v2346_v0  ;;  %v2024_v47 = vpack.c.bf16 %v967_v46, %v966_v45  ;;  %v1084_v45 = vld [vmem:[#allocation11 + $0x128] sm:$0xff] }
  0xc8   :  { %1995 = vmatprep.subr.bf16.mxu0 %v1994_v50  ;;  %v2514_v50 = vld [vmem:[#allocation11 + $0x8] sm:$0xff] }
  0xca   :  { %2019 = vmatpush3.bf16.msra.mxu1 %v2018_v41  ;;  %v1076_v41 = vld [vmem:[#allocation11 + $0xe8] sm:$0xff] }
  0xcb   :  { %1997 = vmatpush1.bf16.msra.mxu0 %v1996_v53  ;;  %2020 = vmatprep.subr.bf16.mxu1 %v2346_v0  ;;  %v2516_v53 = vld [vmem:[#allocation11 + $0x28] sm:$0xff]  ;;  %v1793_v43 = vcombine.high %v1072_v40, %v1076_v41  ;;  %v1792_v46 = vcombine.low %v1072_v40, %v1076_v41  ;;  %v1081_v41 = vld [vmem:[#allocation11 + $0x110] sm:$0xff] }
  0xcc   :  { %1999 = vmatprep.subr.bf16.mxu0 %v1998_v56  ;;  %v1768_v56 = vcombine.low %v2514_v50, %v2516_v53  ;;  %v1769_v57 = vcombine.high %v2514_v50, %v2516_v53  ;;  %v1100_v53 = vld [vmem:[#allocation11 + $0x1a8] sm:$0xff] }
  0xce   :  { %2022 = vmatpush3.bf16.msra.mxu1 %v2021_v44  ;;  %v1080_v44 = vld [vmem:[#allocation11 + $0x108] sm:$0xff] }
  0xcf   :  { %2001 = vmatpush1.bf16.msra.mxu0 %v2000_v59  ;;  %2023 = vmatprep.subr.bf16.mxu1 %v2346_v0  ;;  %v1774_v59 = vcombine.low %v1055_v54, %v1059_v55  ;;  %v1071_v0 = vld [vmem:[#allocation11 + $0xc0] sm:$0xff]  ;;  %v1800_v50 = vcombine.low %v1080_v44, %v1084_v45  ;;  %v1808_v54 = vcombine.low %v1088_v48, %v1092_v49 }
  0xd0   :  { %1473 = vmatprep.subr.bf16.mxu0 %v1767_v52  ;;  %v1791_v2 = vcombine.high %v1071_v0, %v1075_v1  ;;  %v1790_v3 = vcombine.low %v1071_v0, %v1075_v1  ;;  %v1096_v52 = vld [vmem:[#allocation11 + $0x188] sm:$0xff]  ;;  %v1049_v1 = vld [vmem:[#allocation11 + $0x10] sm:$0xff] }
  0xd1   :  { %v1817_v55 = vcombine.high %v1096_v52, %v1100_v53 }
  0xd2   :  { %2025 = vmatpush3.bf16.msra.mxu1 %v2024_v47  ;;  %v1801_v47 = vcombine.high %v1080_v44, %v1084_v45  ;;  %v1086_v44 = vld [vmem:[#allocation11 + $0x138] sm:$0xff] }
  0xd3   :  { %1514 = vmatprep.subr.bf16.mxu1 %v1769_v57  ;;  %v1103_v57 = vld [vmem:[#allocation11 + $0x1c0] sm:$0xff] }
 0x165   :  { %v1846_v4 = vpop.f32.mrb[0].mxu0 }
 0x166   :  { %v1868_v5 = vpop.f32.mrb[0].mxu1  ;;  %v1847_v7 = vpop.f32.mrb[1].mxu0 }
 0x167   :  { %v1869_v8 = vpop.f32.mrb[1].mxu1  ;;  %v1848_v9 = vadd.f32 %v1847_v7, %v1846_v4  ;;  %v1849_v11 = vpop.f32.mrb[2].mxu0  ;;  %v1079_v4 = vld [vmem:[#allocation11 + $0x100] sm:$0xff] }
 0x168   :  { %v1870_v10 = vadd.f32 %v1869_v8, %v1868_v5  ;;  %v1871_v12 = vpop.f32.mrb[2].mxu1  ;;  %v1850_v13 = vpop.f32.mrb[3].mxu0  ;;  %v1083_v5 = vld [vmem:[#allocation11 + $0x120] sm:$0xff] }
 0x169   :  { %v1872_v14 = vpop.f32.mrb[3].mxu1  ;;  %v705_v15 = vadd.f32 %v1848_v9, %v1692_v6  ;;  %v1799_v6 = vcombine.high %v1079_v4, %v1083_v5  ;;  %v1798_v7 = vcombine.low %v1079_v4, %v1083_v5  ;;  %v1087_v8 = vld [vmem:[#allocation11 + $0x140] sm:$0xff]  ;;  %v1054_v5 = vld [vmem:[#allocation11 + $0x38] sm:$0xff] }
 0x16a   :  { %v1091_v9 = vld [vmem:[#allocation11 + $0x160] sm:$0xff] }
 0x16b   :  { %v745_v16 = vadd.f32 %v1870_v10, %v705_v15  ;;  %v1807_v10 = vcombine.high %v1087_v8, %v1091_v9  ;;  %v1806_v11 = vcombine.low %v1087_v8, %v1091_v9  ;;  %v1095_v12 = vld [vmem:[#allocation11 + $0x180] sm:$0xff]  ;;  %v2348_v9 = vmov 0  }
 0x16c   :  { %v1099_v13 = vld [vmem:[#allocation11 + $0x1a0] sm:$0xff] }
 0x16d   :  { %v1815_v14 = vcombine.high %v1095_v12, %v1099_v13  ;;  %v1814_v15 = vcombine.low %v1095_v12, %v1099_v13 }
 0x185   :  { %v1890_v17 = vpop.f32.mrb[4].mxu0 }
 0x186   :  { %v1912_v18 = vpop.f32.mrb[4].mxu1  ;;  %v1891_v19 = vpop.f32.mrb[5].mxu0 }
 0x187   :  { %v1913_v20 = vpop.f32.mrb[5].mxu1  ;;  %v1892_v21 = vadd.f32 %v1891_v19, %v1890_v17  ;;  %v1893_v23 = vpop.f32.mrb[6].mxu0  ;;  %v863_v19 = vld [vmem:[%s2599_s5] sm:$0x3] }
 0x188   :  { %v1914_v22 = vadd.f32 %v1913_v20, %v1912_v18  ;;  %v1915_v24 = vpop.f32.mrb[6].mxu1  ;;  %v1894_v25 = vpop.f32.mrb[7].mxu0 }
 0x189   :  { %v1916_v26 = vpop.f32.mrb[7].mxu1  ;;  %v785_v27 = vadd.f32 %v1892_v21, %v745_v16  ;;  %v865_v16 = vlaneseq }
 0x18b   :  { %v825_v28 = vadd.f32 %v1914_v22, %v785_v27  ;;  %v2522_v17 = vshrl.u32 %v865_v16, 7  ;;  %v1058_v16 = vld [vmem:[#allocation11 + $0x58] sm:$0xff] }
 0x18d   :  { %v830_v29 = vmax.f32 %v825_v28, 0.0  ;;  %v867_v18 = vsub.s32 0, %v2522_v17  ;;  %v871_v20 = vsub.s32 1, %v2522_v17 }
 0x18f   :  { %940 = vmatmul.mubr.f32.vlgmr.msra.gmra.mrb[8].mxu0 %v830_v29  ;;  %v868_v21 = vrot.slane %v863_v19, %v867_v18  ;;  %v872_v22 = vrot.slane %v863_v19, %v871_v20  ;;  %v946_v29 = vld [vmem:[#allocation5] sm:$0xff] }
 0x190   :  { %1474 = vmatpush1.bf16.msra.mxu0 %v1766_v51  ;;  %v1809_v51 = vcombine.high %v1088_v48, %v1092_v49  ;;  %1505 = vmatprep.mubr.bf16.mxu0 %v2348_v9  ;;  %v1062_v19 = vld [vmem:[#allocation11 + $0x78] sm:$0xff]  ;;  %v1089_v49 = vld [vmem:[#allocation11 + $0x150] sm:$0xff] }
 0x191   :  { %1475 = vmatprep.subr.bf16.mxu0 %v1775_v58  ;;  %v1107_v58 = vld [vmem:[#allocation11 + $0x1e0] sm:$0xff] }
 0x192   :  { %v1823_v60 = vcombine.high %v1103_v57, %v1107_v58 }
 0x194   :  { %1476 = vmatpush1.bf16.msra.mxu0 %v1774_v59  ;;  %v1104_v59 = vld [vmem:[#allocation11 + $0x1c8] sm:$0xff] }
 0x195   :  { %1477 = vmatprep.subr.bf16.mxu0 %v1783_v62  ;;  %v1822_v62 = vcombine.low %v1103_v57, %v1107_v58  ;;  %v1825_v0 = vcombine.high %v1104_v59, %v1108_v61  ;;  %v1097_v57 = vld [vmem:[#allocation11 + $0x190] sm:$0xff] }
 0x196   :  { %v1101_v58 = vld [vmem:[#allocation11 + $0x1b0] sm:$0xff] }
 0x198   :  { %1478 = vmatpush1.bf16.msra.mxu0 %v1782_v63  ;;  %v1824_v63 = vcombine.low %v1104_v59, %v1108_v61  ;;  %v1098_v59 = vld [vmem:[#allocation11 + $0x198] sm:$0xff] }
 0x199   :  { %1479 = vmatprep.subr.bf16.mxu0 %v1791_v2  ;;  %v1053_v2 = vld [vmem:[#allocation11 + $0x30] sm:$0xff] }
 0x19a   :  { %v1771_v4 = vcombine.high %v1049_v1, %v1053_v2 }
 0x19c   :  { %1480 = vmatpush1.bf16.msra.mxu0 %v1790_v3  ;;  %v1050_v3 = vld [vmem:[#allocation11 + $0x18] sm:$0xff] }
 0x19d   :  { %1481 = vmatprep.subr.bf16.mxu0 %v1799_v6  ;;  %v1770_v6 = vcombine.low %v1049_v1, %v1053_v2  ;;  %v1773_v8 = vcombine.high %v1050_v3, %v1054_v5  ;;  %v1105_v1 = vld [vmem:[#allocation11 + $0x1d0] sm:$0xff] }
 0x19e   :  { %v1109_v2 = vld [vmem:[#allocation11 + $0x1f0] sm:$0xff] }
 0x1a0   :  { %1482 = vmatpush1.bf16.msra.mxu0 %v1798_v7  ;;  %v1772_v7 = vcombine.low %v1050_v3, %v1054_v5  ;;  %v1106_v3 = vld [vmem:[#allocation11 + $0x1d8] sm:$0xff]  ;;  %v1818_v5 = vcombine.low %v1097_v57, %v1101_v58 }
 0x1a1   :  { %1483 = vmatprep.subr.bf16.mxu0 %v1807_v10  ;;  %v1765_v10 = vld [vmem:[%s2601_s7] ss:$0 sm:$0xff]  ;;  %s2349_s7 = smov [#allocation14]  }
 0x1a2   :  { %s1663_s25 = sshll.u32 %s2349_s7, 4  ;;  %s1664_s25 = int_to_ptr.vmem [resolvable:$true] %s1663_s25 }
 0x1a3   :  { %s2253_s26 = scalar_lea.vmem %s1664_s25, 128  ;;  %p2258_p7 = scmp.lt.s32.totalorder %s1664_s25, %s1664_s25 }
 0x1a4   :  { %1484 = vmatpush1.bf16.msra.mxu0 %v1806_v11  ;;  %p2254_p6 = scmp.ne.s32.totalorder %s1664_s25, %s2253_s26  ;;  %p2259_p8 = scmp.lt.s32.totalorder %s2253_s26, %s2253_s26 }
 0x1a5   :  { %1485 = vmatprep.subr.bf16.mxu0 %v1815_v14  ;;  %v1057_v14 = vld [vmem:[#allocation11 + $0x50] sm:$0xff] }
 0x1a6   :  { %p2260_p9 = por %p2259_p8, %p2258_p7 }
 0x1a8   :  { %1486 = vmatpush1.bf16.msra.mxu0 %v1814_v15  ;;  %v1061_v15 = vld [vmem:[#allocation11 + $0x70] sm:$0xff]  ;;  %p2261_p10 = pnand %p2260_p9, %p2254_p6 }
 0x1a9   :  { %1487 = vmatprep.subr.bf16.mxu0 %v1823_v60  ;;  %v1102_v60 = vld [vmem:[#allocation11 + $0x1b8] sm:$0xff] }
 0x1ac   :  { %1488 = vmatpush1.bf16.msra.mxu0 %v1822_v62 }
 0x1ad   :  { %1555 = vmatprep.subr.bf16.mxu0 %v1771_v4  ;;  %v1110_v4 = vld [vmem:[#allocation11 + $0x1f8] sm:$0xff] }
 0x262   :  { %v941_v23 = vpop.f32.mrb[8].mxu0 }
 0x263   :  { %v942_v24 = vadd.f32 %v941_v23, %v868_v21  ;;  %v943_v25 = vpop.f32.mrb[9].mxu0  ;;  %v1779_v23 = vcombine.high %v1057_v14, %v1061_v15 }
 0x264   :  { %v944_v26 = vadd.f32 %v943_v25, %v872_v22  ;;  %v1065_v25 = vld [vmem:[#allocation11 + $0x90] sm:$0xff] }
 0x265   :  { %1645 = vst [vmem:[#allocation14] sm:$0xff] %v942_v24 }
 0x266   :  { %v947_v27 = vmul.f32 0.5, %v944_v26  ;;  %1646 = vst [vmem:[#allocation16] sm:$0xff] %v944_v26  ;;  %v1069_v26 = vld [vmem:[#allocation11 + $0xb0] sm:$0xff] }
 0x267   :  { %v1787_v31 = vcombine.high %v1065_v25, %v1069_v26  ;;  %v1786_v37 = vcombine.low %v1065_v25, %v1069_v26 }
 0x268   :  { %v948_v28 = vmul.f32 1.442695, %v947_v27  ;;  %v1066_v27 = vld [vmem:[#allocation11 + $0x98] sm:$0xff] }
 0x26a   :  { %2119 = vpow2.f32 %v948_v28  ;;  %v1070_v28 = vld [vmem:[#allocation11 + $0xb8] sm:$0xff] }
 0x26b   :  { %v1789_v32 = vcombine.high %v1066_v27, %v1070_v28 }
 0x274   :  { %v2120_v30 = vpop.eup %2119 }
 0x275   :  { %v950_v33 = vmul.f32 %v2120_v30, %v946_v29  ;;  %v1778_v29 = vcombine.low %v1057_v14, %v1061_v15  ;;  %v1780_v30 = vcombine.low %v1058_v16, %v1062_v19 }
 0x277   :  { %v951_v34 = vadd.f32 %v950_v33, %v942_v24  ;;  %v1781_v24 = vcombine.high %v1058_v16, %v1062_v19  ;;  %v1073_v33 = vld [vmem:[#allocation11 + $0xd0] sm:$0xff] }
 0x279   :  { %1968 = vmatmul.mubr.f32.vlgmr.msra.gmra.mrb[8].mxu1 %v951_v34  ;;  %v1077_v34 = vld [vmem:[#allocation11 + $0xf0] sm:$0xff] }
 0x27a   :  { %1515 = vmatpush1.bf16.msra.mxu1 %v1768_v56  ;;  %v1816_v56 = vcombine.low %v1096_v52, %v1100_v53  ;;  %1546 = vmatprep.mubr.bf16.mxu1 %v2348_v9  ;;  %v1794_v45 = vcombine.low %v1073_v33, %v1077_v34  ;;  %v1094_v52 = vld [vmem:[#allocation11 + $0x178] sm:$0xff] }
 0x27b   :  { %1516 = vmatprep.subr.bf16.mxu1 %v1777_v35  ;;  %v1074_v35 = vld [vmem:[#allocation11 + $0xd8] sm:$0xff] }
 0x27c   :  { %v1797_v40 = vcombine.high %v1074_v35, %v1078_v36 }
 0x27e   :  { %1517 = vmatpush1.bf16.msra.mxu1 %v1776_v38  ;;  %v1788_v38 = vcombine.low %v1066_v27, %v1070_v28 }
 0x27f   :  { %1518 = vmatprep.subr.bf16.mxu1 %v1785_v39  ;;  %v1795_v39 = vcombine.high %v1073_v33, %v1077_v34 }
 0x282   :  { %1519 = vmatpush1.bf16.msra.mxu1 %v1784_v42  ;;  %v1085_v42 = vld [vmem:[#allocation11 + $0x130] sm:$0xff] }
 0x283   :  { %1520 = vmatprep.subr.bf16.mxu1 %v1793_v43  ;;  %v1082_v43 = vld [vmem:[#allocation11 + $0x118] sm:$0xff]  ;;  %v1802_v53 = vcombine.low %v1081_v41, %v1085_v42 }
 0x284   :  { %v1805_v48 = vcombine.high %v1082_v43, %v1086_v44 }
 0x286   :  { %1521 = vmatpush1.bf16.msra.mxu1 %v1792_v46  ;;  %v1796_v46 = vcombine.low %v1074_v35, %v1078_v36 }
 0x287   :  { %1522 = vmatprep.subr.bf16.mxu1 %v1801_v47  ;;  %v1803_v47 = vcombine.high %v1081_v41, %v1085_v42 }
 0x28a   :  { %1523 = vmatpush1.bf16.msra.mxu1 %v1800_v50  ;;  %v1093_v50 = vld [vmem:[#allocation11 + $0x170] sm:$0xff] }
 0x28b   :  { %1524 = vmatprep.subr.bf16.mxu1 %v1809_v51  ;;  %v1090_v51 = vld [vmem:[#allocation11 + $0x158] sm:$0xff]  ;;  %v1810_v61 = vcombine.low %v1089_v49, %v1093_v50 }
 0x28c   :  { %v1812_v62 = vcombine.low %v1090_v51, %v1094_v52 }
 0x28e   :  { %1525 = vmatpush1.bf16.msra.mxu1 %v1808_v54  ;;  %v1804_v54 = vcombine.low %v1082_v43, %v1086_v44 }
 0x28f   :  { %1526 = vmatprep.subr.bf16.mxu1 %v1817_v55  ;;  %v1811_v55 = vcombine.high %v1089_v49, %v1093_v50 }
 0x292   :  { %1527 = vmatpush1.bf16.msra.mxu1 %v1816_v56  ;;  %v1813_v56 = vcombine.high %v1090_v51, %v1094_v52 }
 0x293   :  { %1528 = vmatprep.subr.bf16.mxu1 %v1825_v0  ;;  %v1821_v0 = vcombine.high %v1098_v59, %v1102_v60 }
 0x296   :  { %1529 = vmatpush1.bf16.msra.mxu1 %v1824_v63  ;;  %v1819_v63 = vcombine.high %v1097_v57, %v1101_v58 }
 0x297   :  { %1596 = vmatprep.subr.bf16.mxu1 %v1773_v8  ;;  %v1829_v8 = vcombine.high %v1106_v3, %v1110_v4 }
 0x34c   :  { %v1041_v11 = vpop.f32.mrb[8].mxu1 }
 0x34d   :  { %v1042_v12 = vadd.f32 %v1765_v10, %v1041_v11  ;;  %v1969_v13 = vpop.f32.mrb[9].mxu1  ;;  %v1828_v10 = vcombine.low %v1106_v3, %v1110_v4 }
 0x34f   :  { %v1045_v21 = vmax.f32 %v1042_v12, 0.0 }
 0x351   :  { %v2539_v22 = vpack.c.bf16 %v1045_v21, %v1045_v21 }
 0x353   :  { %1506 = vmatmul.mubr.bf16.vlgmr.msra.gmra.mrb[12].mxu0 %v2539_v22  ;;  %1547 = vmatmul.mubr.bf16.vlgmr.msra.gmra.mrb[12].mxu1 %v2539_v22 }
 0x354   :  { %1556 = vmatpush1.bf16.msra.mxu0 %v1770_v6  ;;  %1597 = vmatpush1.bf16.msra.mxu1 %v1772_v7  ;;  %v1820_v6 = vcombine.low %v1098_v59, %v1102_v60  ;;  %v1827_v7 = vcombine.high %v1105_v1, %v1109_v2 }
 0x355   :  { %1557 = vmatprep.subr.bf16.mxu0 %v1779_v23  ;;  %1598 = vmatprep.subr.bf16.mxu1 %v1781_v24 }
 0x356   :  { %1587 = vmatprep.mubr.bf16.mxu0 %v2348_v9  ;;  %1628 = vmatprep.mubr.bf16.mxu1 %v2348_v9  ;;  %v1826_v9 = vcombine.low %v1105_v1, %v1109_v2 }
 0x358   :  { %1558 = vmatpush1.bf16.msra.mxu0 %v1778_v29  ;;  %1599 = vmatpush1.bf16.msra.mxu1 %v1780_v30 }
 0x359   :  { %1559 = vmatprep.subr.bf16.mxu0 %v1787_v31  ;;  %1600 = vmatprep.subr.bf16.mxu1 %v1789_v32 }
 0x35c   :  { %1560 = vmatpush1.bf16.msra.mxu0 %v1786_v37  ;;  %1601 = vmatpush1.bf16.msra.mxu1 %v1788_v38 }
 0x35d   :  { %1561 = vmatprep.subr.bf16.mxu0 %v1795_v39  ;;  %1602 = vmatprep.subr.bf16.mxu1 %v1797_v40 }
 0x360   :  { %1562 = vmatpush1.bf16.msra.mxu0 %v1794_v45  ;;  %1603 = vmatpush1.bf16.msra.mxu1 %v1796_v46 }
 0x361   :  { %1563 = vmatprep.subr.bf16.mxu0 %v1803_v47  ;;  %1604 = vmatprep.subr.bf16.mxu1 %v1805_v48 }
 0x364   :  { %1564 = vmatpush1.bf16.msra.mxu0 %v1802_v53  ;;  %1605 = vmatpush1.bf16.msra.mxu1 %v1804_v54 }
 0x365   :  { %1565 = vmatprep.subr.bf16.mxu0 %v1811_v55  ;;  %1606 = vmatprep.subr.bf16.mxu1 %v1813_v56 }
 0x368   :  { %1566 = vmatpush1.bf16.msra.mxu0 %v1810_v61  ;;  %1607 = vmatpush1.bf16.msra.mxu1 %v1812_v62 }
 0x369   :  { %1567 = vmatprep.subr.bf16.mxu0 %v1819_v63  ;;  %1608 = vmatprep.subr.bf16.mxu1 %v1821_v0 }
 0x36c   :  { %1568 = vmatpush1.bf16.msra.mxu0 %v1818_v5  ;;  %1609 = vmatpush1.bf16.msra.mxu1 %v1820_v6 }
 0x36d   :  { %1569 = vmatprep.subr.bf16.mxu0 %v1827_v7  ;;  %1610 = vmatprep.subr.bf16.mxu1 %v1829_v8 }
 0x370   :  { %1570 = vmatpush1.bf16.msra.mxu0 %v1826_v9  ;;  %1611 = vmatpush1.bf16.msra.mxu1 %v1828_v10 }
 0x373   :  { %1588 = vmatmul.mubr.bf16.vlgmr.msra.gmra.mrb[16].mxu0 %v2539_v22  ;;  %1629 = vmatmul.mubr.bf16.vlgmr.msra.gmra.mrb[16].mxu1 %v2539_v22 }
 0x374   :  { %2264 = shalt.err (!%p2261_p10)
}
 0x375   :  { %s2265_s1 = scalar_lea.hbm %s2605_s11, 128 }
 0x376   :  { %p2266_p11 = scmp.ne.s32.totalorder %s2605_s11, %s2265_s1  ;;  %p2269_p12 = scmp.lt.u32.totalorder %s2265_s1, %s2605_s11 }
 0x378   :  { %p2271_p13 = pnand %p2269_p12, %p2266_p11 }
 0x37a   :  { %2274 = shalt.err (!%p2271_p13)
}
 0x37b   :  { %1666 = dma.vmem_to_hbm [thread:$0]  %s1664_s25, 128, %s2605_s11, [#allocation15]  }
 0x37c   :  { %s2350_s30 = smov [#allocation16]  }
 0x37d   :  { %s1673_s15 = sshll.u32 %s2350_s30, 4  ;;  %s1674_s15 = int_to_ptr.vmem [resolvable:$true] %s1673_s15 }
 0x37e   :  { %s2275_s16 = scalar_lea.vmem %s1674_s15, 128  ;;  %p2280_p1 = scmp.lt.s32.totalorder %s1674_s15, %s1674_s15 }
 0x37f   :  { %p2276_p0 = scmp.ne.s32.totalorder %s1674_s15, %s2275_s16  ;;  %p2281_p2 = scmp.lt.s32.totalorder %s2275_s16, %s2275_s16 }
 0x381   :  { %p2282_p3 = por %p2281_p2, %p2280_p1 }
 0x383   :  { %p2283_p4 = pnand %p2282_p3, %p2276_p0 }
 0x385   :  { %2286 = shalt.err (!%p2283_p4)
}
 0x386   :  { %s2287_s6 = scalar_lea.hbm %s2606_s12, 128 }
 0x387   :  { %p2288_p5 = scmp.ne.s32.totalorder %s2606_s12, %s2287_s6  ;;  %p2291_p6 = scmp.lt.u32.totalorder %s2287_s6, %s2606_s12 }
 0x389   :  { %p2293_p7 = pnand %p2291_p6, %p2288_p5 }
 0x38b   :  { %2296 = shalt.err (!%p2293_p7)
}
 0x38c   :  { %1676 = dma.vmem_to_hbm [thread:$0]  %s1674_s15, 128, %s2606_s12, [#allocation15]   ;;  %v1123_v11 = vsub.s32 2, %v2522_v17  ;;  %v1111_v12 = vld [vmem:[%s2603_s9] sm:$0xff]  ;;  %v1127_v13 = vsub.s32 3, %v2522_v17  ;;  %v1135_v33 = vsub.s32 5, %v2522_v17 }
 0x38d   :  { %v1116_v14 = vrot.slane %v1111_v12, %v867_v18  ;;  %v1120_v16 = vrot.slane %v1111_v12, %v871_v20  ;;  %v1131_v18 = vsub.s32 4, %v2522_v17  ;;  %v1139_v20 = vsub.s32 6, %v2522_v17  ;;  %s2351_s9 = smov [#allocation13]  }
 0x38e   :  { %v1124_v15 = vrot.slane %v1111_v12, %v1123_v11  ;;  %v1128_v19 = vrot.slane %v1111_v12, %v1127_v13  ;;  %v1143_v34 = vsub.s32 7, %v2522_v17  ;;  %v1136_v37 = vrot.slane %v1111_v12, %v1135_v33  ;;  %s1653_s12 = sshll.u32 %s2351_s9, 4  ;;  %s1654_s12 = int_to_ptr.vmem [resolvable:$true] %s1653_s12 }
 0x38f   :  { %v1132_v35 = vrot.slane %v1111_v12, %v1131_v18  ;;  %v1140_v36 = vrot.slane %v1111_v12, %v1139_v20  ;;  %s2297_s5 = scalar_lea.vmem %s1654_s12, 1024  ;;  %p2302_p9 = scmp.lt.s32.totalorder %s1654_s12, %s1654_s12 }
 0x390   :  { %v1144_v38 = vrot.slane %v1111_v12, %v1143_v34  ;;  %p2298_p8 = scmp.ne.s32.totalorder %s1654_s12, %s2297_s5  ;;  %p2303_p10 = scmp.lt.s32.totalorder %s2297_s5, %s2297_s5 }
 0x392   :  { %p2304_p11 = por %p2303_p10, %p2302_p9 }
 0x394   :  { %p2305_p12 = pnand %p2304_p11, %p2298_p8 }
 0x426   :  { %v1507_v21 = vpop.f32.mrb[12].mxu0  ;;  %v1548_v22 = vpop.f32.mrb[12].mxu1 }
 0x427   :  { %v1508_v23 = vadd.f32 %v1507_v21, %v1116_v14  ;;  %v1549_v24 = vadd.f32 %v1548_v22, %v1124_v15  ;;  %v1509_v25 = vpop.f32.mrb[13].mxu0  ;;  %v1550_v26 = vpop.f32.mrb[13].mxu1 }
 0x428   :  { %v1510_v27 = vadd.f32 %v1509_v25, %v1120_v16  ;;  %v1551_v28 = vadd.f32 %v1550_v26, %v1128_v19  ;;  %v1511_v29 = vpop.f32.mrb[14].mxu0  ;;  %v1552_v30 = vpop.f32.mrb[14].mxu1 }
 0x429   :  { %1637 = vst [vmem:[#allocation13] sm:$0xff] %v1508_v23  ;;  %1639 = vst [vmem:[#allocation13 + $0x10] sm:$0xff] %v1549_v24  ;;  %v1512_v31 = vpop.f32.mrb[15].mxu0  ;;  %v1553_v32 = vpop.f32.mrb[15].mxu1 }
 0x42a   :  { %1638 = vst [vmem:[#allocation13 + $0x8] sm:$0xff] %v1510_v27  ;;  %1640 = vst [vmem:[#allocation13 + $0x18] sm:$0xff] %v1551_v28 }
 0x446   :  { %v1589_v39 = vpop.f32.mrb[16].mxu0  ;;  %v1630_v40 = vpop.f32.mrb[16].mxu1 }
 0x447   :  { %v1590_v41 = vadd.f32 %v1589_v39, %v1132_v35  ;;  %v1631_v42 = vadd.f32 %v1630_v40, %v1140_v36  ;;  %v1591_v43 = vpop.f32.mrb[17].mxu0  ;;  %v1632_v44 = vpop.f32.mrb[17].mxu1 }
 0x448   :  { %v1592_v45 = vadd.f32 %v1591_v43, %v1136_v37  ;;  %v1633_v46 = vadd.f32 %v1632_v44, %v1144_v38  ;;  %v1593_v47 = vpop.f32.mrb[18].mxu0  ;;  %v1634_v48 = vpop.f32.mrb[18].mxu1 }
 0x449   :  { %1641 = vst [vmem:[#allocation13 + $0x20] sm:$0xff] %v1590_v41  ;;  %1643 = vst [vmem:[#allocation13 + $0x30] sm:$0xff] %v1631_v42  ;;  %v1594_v17 = vpop.f32.mrb[19].mxu0  ;;  %v1635_v49 = vpop.f32.mrb[19].mxu1 }
 0x44a   :  { %1642 = vst [vmem:[#allocation13 + $0x28] sm:$0xff] %v1592_v45  ;;  %1644 = vst [vmem:[#allocation13 + $0x38] sm:$0xff] %v1633_v46 }
 0x44b   :  { %2308 = shalt.err (!%p2305_p12)
}
 0x44c   :  { %s2309_s25 = scalar_lea.hbm %s2604_s10, 1024 }
 0x44d   :  { %p2310_p13 = scmp.ne.s32.totalorder %s2604_s10, %s2309_s25  ;;  %p2313_p0 = scmp.lt.u32.totalorder %s2309_s25, %s2604_s10 }
 0x44f   :  { %p2315_p1 = pnand %p2313_p0, %p2310_p13 }
 0x451   :  { %2318 = shalt.err (!%p2315_p1)
}
 0x452   :  { %1656 = dma.vmem_to_hbm [thread:$0]  %s1654_s12, 1024, %s2604_s10, [#allocation4]  }
 0x453   :  { %2327 = dma.done.wait [#allocation4], 1024  }
 0x454   :  { %2328 = vsyncadd [#allocation4], 4294966272 }
 0x455   :  { %2329 = dma.done.wait [#allocation15], 256  }
 0x456   :  { %2330 = vsyncadd [#allocation15], 4294967040 }
 0x457   :  { %1686 = vsyncpa [#allocation3], 1 }
 0x458   :  { %1687 = vsyncpa [#allocation6], 1 }
 0x459   :  { %1688 = vsyncpa [#allocation9], 1 }
 0x45a   :  { %1689 = vsyncpa [#allocation12], 1 }
 0x45b   :  { %1690 = vsyncpa [#allocation4], 1 }
 0x45c   :  { %1691 = vsyncpa [#allocation15], 1 }

</bundles_post_ra>
